<compile_context>
chip_gen: v6e
topology: v6e:2x2x1
jax: 0.10.0
libtpu: 0.0.40
codegen_flags: <defaults>
</compile_context>

<pallas_src>
import jax
import jax.numpy as jnp
from jax.experimental import pallas as pl
from jax.experimental.pallas import tpu as pltpu


def meta_path_kernel(img_ref, meta_ref,
                     w_enc1_ref, b_enc1_ref, w_enc2_ref, b_enc2_ref,
                     w_meta_ref, b_meta_ref,
                     w_attn_img_ref, w_attn_meta_ref, b_attn_ref,
                     out_ref):
    img = img_ref[...]                                     # [TB, F]
    meta = meta_ref[...]                                   # [TB, 2]

    # meta_encoder: Linear(2 -> H1) + ReLU + Linear(H1 -> M).
    # K=2 stage as VPU broadcast-MAC (MXU would be 99% idle at K=2).
    h1 = (meta[:, 0:1] * w_enc1_ref[0:1, :]
          + meta[:, 1:2] * w_enc1_ref[1:2, :]
          + b_enc1_ref[...])                               # [TB, H1]
    h1 = jnp.maximum(h1, 0.0)
    meta_feat = (jnp.dot(h1, w_enc2_ref[...],
                         preferred_element_type=jnp.float32)
                 + b_enc2_ref[...])                        # [TB, M]

    # meta_fusion.meta_proj: Linear(M -> F) on the MXU.
    proj = (jnp.dot(meta_feat, w_meta_ref[...],
                    preferred_element_type=jnp.float32)
            + b_meta_ref[...])                             # [TB, F]

    # meta_fusion.attn: Linear(2F -> 1) on concat([img, proj], -1)
    #   == <img, w_attn[:F]> + <proj, w_attn[F:]> + b
    # VPU multiply + XLU lane reduce (both otherwise idle units).
    logit = (jnp.sum(img * w_attn_img_ref[...], axis=-1, keepdims=True)
             + jnp.sum(proj * w_attn_meta_ref[...], axis=-1, keepdims=True)
             + b_attn_ref[0])                              # [TB, 1]

    w = jax.nn.sigmoid(logit)                              # broadcasts over F
    out_ref[...] = (img * w + proj * (1.0 - w)).astype(out_ref.dtype)


def meta_path(img_feat, meta, params, *, block_rows=512):
    """img_feat: [B, F] f32 (global_feat_weighted), meta: [B, 2] f32.

    block_rows: max batch rows per grid step (rounded to a multiple of 8).
    512 rows of f32 at F=2048 is ~4 MiB per in/out block -> well inside the
    32 MiB scoped-VMEM default even double-buffered on v7x (64 MiB physical),
    with the resident weights (~1 MiB) on top.
    """
    B, F = img_feat.shape
    (w_enc1, b_enc1, w_enc2, b_enc2,
     w_meta, b_meta, w_attn_img, w_attn_meta, b_attn) = params
    H1 = w_enc1.shape[1]
    M = w_enc2.shape[1]

    # Batch tile: multiple of 8, no larger than needed.
    tb = max(8, (min(block_rows, B + 7) // 8) * 8)
    b_pad = pl.cdiv(B, tb) * tb
    if b_pad != B:
        img_feat = jnp.pad(img_feat, ((0, b_pad - B), (0, 0)))
        meta = jnp.pad(meta, ((0, b_pad - B), (0, 0)))
    grid = (b_pad // tb,)

    vmem = pltpu.MemorySpace.VMEM
    const = lambda i: (0, 0)   # weights: same block every step -> stay resident

    cost = pl.CostEstimate(
        flops=b_pad * (2 * 2 * H1 + 2 * H1 * M + 2 * M * F + 8 * F),
        transcendentals=b_pad,
        bytes_accessed=4 * (2 * b_pad * F + 2 * b_pad
                            + 2 * H1 + H1 * M + M + M * F + 3 * F + 1),
    )

    out = pl.pallas_call(
        meta_path_kernel,
        out_shape=jax.ShapeDtypeStruct((b_pad, F), jnp.float32),
        grid=grid,
        in_specs=[
            pl.BlockSpec((tb, F), lambda i: (i, 0), memory_space=vmem),  # img
            pl.BlockSpec((tb, 2), lambda i: (i, 0), memory_space=vmem),  # meta (raw)
            pl.BlockSpec((2, H1), const, memory_space=vmem),             # enc Linear1 W
            pl.BlockSpec((1, H1), const, memory_space=vmem),             # enc Linear1 b
            pl.BlockSpec((H1, M), const, memory_space=vmem),             # enc Linear2 W
            pl.BlockSpec((1, M), const, memory_space=vmem),              # enc Linear2 b
            pl.BlockSpec((M, F), const, memory_space=vmem),              # meta_proj W
            pl.BlockSpec((1, F), const, memory_space=vmem),              # meta_proj b
            pl.BlockSpec((1, F), const, memory_space=vmem),              # attn W (img half)
            pl.BlockSpec((1, F), const, memory_space=vmem),              # attn W (meta half)
            pl.BlockSpec(memory_space=pltpu.MemorySpace.SMEM),           # attn b scalar
        ],
        out_specs=pl.BlockSpec((tb, F), lambda i: (i, 0), memory_space=vmem),
        compiler_params=pltpu.CompilerParams(
            dimension_semantics=("parallel",)),
        cost_estimate=cost,
    )(img_feat, meta, w_enc1, b_enc1, w_enc2, b_enc2,
      w_meta, b_meta, w_attn_img, w_attn_meta, b_attn)

    return out[:B] if b_pad != B else out


def init_params(key, feat_dim, meta_dim, enc_hidden=64, meta_raw=2):
    """Deterministic init mirroring nn.Linear shapes (uniform +/- 1/sqrt(fan_in)).

    All weights stored pre-transposed as [in, out] so the kernel computes x @ W.
    The attention Linear(2F -> 1) weight is split into two [1, F] row vectors.
    """
    ks = jax.random.split(key, 9)
    b_e1 = 1.0 / (meta_raw ** 0.5)
    b_e2 = 1.0 / (enc_hidden ** 0.5)
    b_mp = 1.0 / (meta_dim ** 0.5)
    b_at = 1.0 / ((2 * feat_dim) ** 0.5)

    w_enc1 = jax.random.uniform(ks[0], (meta_raw, enc_hidden), jnp.float32, -b_e1, b_e1)
    b_enc1 = jax.random.uniform(ks[1], (1, enc_hidden), jnp.float32, -b_e1, b_e1)
    w_enc2 = jax.random.uniform(ks[2], (enc_hidden, meta_dim), jnp.float32, -b_e2, b_e2)
    b_enc2 = jax.random.uniform(ks[3], (1, meta_dim), jnp.float32, -b_e2, b_e2)
    w_meta = jax.random.uniform(ks[4], (meta_dim, feat_dim), jnp.float32, -b_mp, b_mp)
    b_meta = jax.random.uniform(ks[5], (1, feat_dim), jnp.float32, -b_mp, b_mp)
    w_attn_img = jax.random.uniform(ks[6], (1, feat_dim), jnp.float32, -b_at, b_at)
    w_attn_meta = jax.random.uniform(ks[7], (1, feat_dim), jnp.float32, -b_at, b_at)
    b_attn = jax.random.uniform(ks[8], (1,), jnp.float32, -b_at, b_at)
    return (w_enc1, b_enc1, w_enc2, b_enc2,
            w_meta, b_meta, w_attn_img, w_attn_meta, b_attn)


def meta_path_ref(img_feat, meta, params):
    (w_enc1, b_enc1, w_enc2, b_enc2,
     w_meta, b_meta, w_attn_img, w_attn_meta, b_attn) = params
    hi = jax.lax.Precision.HIGHEST
    h1 = jnp.maximum(jnp.dot(meta, w_enc1, precision=hi) + b_enc1, 0.0)
    meta_feat = jnp.dot(h1, w_enc2, precision=hi) + b_enc2
    proj = jnp.dot(meta_feat, w_meta, precision=hi) + b_meta
    logit = (jnp.dot(img_feat, w_attn_img.T, precision=hi)
             + jnp.dot(proj, w_attn_meta.T, precision=hi) + b_attn)
    w = jax.nn.sigmoid(logit)
    return img_feat * w + proj * (1.0 - w)


if __name__ == "__main__":
    B, FEAT_DIM, META_DIM, ENC_HIDDEN, META_RAW = 16, 256, 128, 64, 2

    key = jax.random.PRNGKey(0)
    k_img, k_meta, k_params = jax.random.split(key, 3)
    img_feat = jax.random.normal(k_img, (B, FEAT_DIM), jnp.float32)
    meta = jax.random.normal(k_meta, (B, META_RAW), jnp.float32)
    params = init_params(k_params, FEAT_DIM, META_DIM, ENC_HIDDEN, META_RAW)

    # block_rows=8 -> grid=(2,) at this test size, exercising the batch tiling
    # and the resident-weight BlockSpecs. At production size leave the default.
    out = meta_path(img_feat, meta, params, block_rows=8)
    out = jax.block_until_ready(out)

    ref = meta_path_ref(img_feat, meta, params)
    assert out.shape == (B, FEAT_DIM)
    assert jnp.allclose(out, ref, atol=1e-4, rtol=1e-4)

    print("KERNEL_OK")
</pallas_src>

<mosaic_0001>
module attributes {stable_mosaic.version = 11 : i64} {
  func.func @meta_path_kernel(%arg0: i32, %arg1: memref<8x256xf32, #tpu.memory_space<vmem>>, %arg2: memref<8x2xf32, #tpu.memory_space<vmem>>, %arg3: memref<2x64xf32, #tpu.memory_space<vmem>>, %arg4: memref<1x64xf32, #tpu.memory_space<vmem>>, %arg5: memref<64x128xf32, #tpu.memory_space<vmem>>, %arg6: memref<1x128xf32, #tpu.memory_space<vmem>>, %arg7: memref<128x256xf32, #tpu.memory_space<vmem>>, %arg8: memref<1x256xf32, #tpu.memory_space<vmem>>, %arg9: memref<1x256xf32, #tpu.memory_space<vmem>>, %arg10: memref<1x256xf32, #tpu.memory_space<vmem>>, %arg11: memref<1xf32, #tpu.memory_space<smem>>, %arg12: memref<8x256xf32, #tpu.memory_space<vmem>>) attributes {dimension_semantics = [#tpu.dimension_semantics<parallel>], iteration_bounds = array<i64: 2>, scalar_prefetch = 0 : i64, scratch_operands = 0 : i64, tpu.core_type = #tpu.core_type<tc>, window_params = [{transform_indices = @transform_0, window_bounds = array<i64: 8, 256>}, {transform_indices = @transform_1, window_bounds = array<i64: 8, 2>}, {pipeline_mode = #tpu.pipeline_mode<synchronous>, transform_indices = @transform_2, window_bounds = array<i64: 2, 64>}, {pipeline_mode = #tpu.pipeline_mode<synchronous>, transform_indices = @transform_3, window_bounds = array<i64: 1, 64>}, {pipeline_mode = #tpu.pipeline_mode<synchronous>, transform_indices = @transform_4, window_bounds = array<i64: 64, 128>}, {pipeline_mode = #tpu.pipeline_mode<synchronous>, transform_indices = @transform_5, window_bounds = array<i64: 1, 128>}, {pipeline_mode = #tpu.pipeline_mode<synchronous>, transform_indices = @transform_6, window_bounds = array<i64: 128, 256>}, {pipeline_mode = #tpu.pipeline_mode<synchronous>, transform_indices = @transform_7, window_bounds = array<i64: 1, 256>}, {pipeline_mode = #tpu.pipeline_mode<synchronous>, transform_indices = @transform_8, window_bounds = array<i64: 1, 256>}, {pipeline_mode = #tpu.pipeline_mode<synchronous>, transform_indices = @transform_9, window_bounds = array<i64: 1, 256>}, {transform_indices = @transform_10, window_bounds = array<i64: 1>}, {transform_indices = @transform_11, window_bounds = array<i64: 8, 256>}]} {
    %c0 = arith.constant 0 : index
    %c0_0 = arith.constant 0 : index
    %0 = vector.load %arg1[%c0, %c0_0] : memref<8x256xf32, #tpu.memory_space<vmem>>, vector<8x256xf32>
    %c0_1 = arith.constant 0 : index
    %c0_2 = arith.constant 0 : index
    %1 = vector.load %arg2[%c0_1, %c0_2] : memref<8x2xf32, #tpu.memory_space<vmem>>, vector<8x2xf32>
    %2 = vector.extract_strided_slice %1 {offsets = [0, 0], sizes = [8, 1], strides = [1, 1]} : vector<8x2xf32> to vector<8x1xf32>
    %c0_3 = arith.constant 0 : index
    %c0_4 = arith.constant 0 : index
    %3 = vector.load %arg3[%c0_3, %c0_4] : memref<2x64xf32, #tpu.memory_space<vmem>>, vector<1x64xf32>
    %4 = vector.broadcast %2 : vector<8x1xf32> to vector<8x64xf32>
    %5 = vector.broadcast %3 : vector<1x64xf32> to vector<8x64xf32>
    %6 = arith.mulf %4, %5 : vector<8x64xf32>
    %7 = vector.extract_strided_slice %1 {offsets = [0, 1], sizes = [8, 1], strides = [1, 1]} : vector<8x2xf32> to vector<8x1xf32>
    %c1 = arith.constant 1 : index
    %c0_5 = arith.constant 0 : index
    %8 = vector.load %arg3[%c1, %c0_5] : memref<2x64xf32, #tpu.memory_space<vmem>>, vector<1x64xf32>
    %9 = vector.broadcast %7 : vector<8x1xf32> to vector<8x64xf32>
    %10 = vector.broadcast %8 : vector<1x64xf32> to vector<8x64xf32>
    %11 = arith.mulf %9, %10 : vector<8x64xf32>
    %12 = arith.addf %6, %11 : vector<8x64xf32>
    %c0_6 = arith.constant 0 : index
    %c0_7 = arith.constant 0 : index
    %13 = vector.load %arg4[%c0_6, %c0_7] : memref<1x64xf32, #tpu.memory_space<vmem>>, vector<1x64xf32>
    %14 = vector.broadcast %13 : vector<1x64xf32> to vector<8x64xf32>
    %15 = arith.addf %12, %14 : vector<8x64xf32>
    %cst = arith.constant 0.000000e+00 : f32
    %16 = vector.broadcast %cst : f32 to vector<8x64xf32>
    %17 = arith.maximumf %15, %16 : vector<8x64xf32>
    %c0_8 = arith.constant 0 : index
    %c0_9 = arith.constant 0 : index
    %18 = vector.load %arg5[%c0_8, %c0_9] : memref<64x128xf32, #tpu.memory_space<vmem>>, vector<64x128xf32>
    %cst_10 = arith.constant dense<0.000000e+00> : vector<8x128xf32>
    %19 = tpu.matmul %17, %18, %cst_10 {dimension_numbers = #tpu.dot_dimension_numbers<[1], [0], [0], [1], [0, 0, 1, 1], [], []>} : vector<8x64xf32>, vector<64x128xf32>, vector<8x128xf32> -> vector<8x128xf32>
    %c0_11 = arith.constant 0 : index
    %c0_12 = arith.constant 0 : index
    %20 = vector.load %arg6[%c0_11, %c0_12] : memref<1x128xf32, #tpu.memory_space<vmem>>, vector<1x128xf32>
    %21 = vector.broadcast %20 : vector<1x128xf32> to vector<8x128xf32>
    %22 = arith.addf %19, %21 : vector<8x128xf32>
    %c0_13 = arith.constant 0 : index
    %c0_14 = arith.constant 0 : index
    %23 = vector.load %arg7[%c0_13, %c0_14] : memref<128x256xf32, #tpu.memory_space<vmem>>, vector<128x256xf32>
    %cst_15 = arith.constant dense<0.000000e+00> : vector<8x256xf32>
    %24 = tpu.matmul %22, %23, %cst_15 {dimension_numbers = #tpu.dot_dimension_numbers<[1], [0], [0], [1], [0, 0, 1, 1], [], []>} : vector<8x128xf32>, vector<128x256xf32>, vector<8x256xf32> -> vector<8x256xf32>
    %c0_16 = arith.constant 0 : index
    %c0_17 = arith.constant 0 : index
    %25 = vector.load %arg8[%c0_16, %c0_17] : memref<1x256xf32, #tpu.memory_space<vmem>>, vector<1x256xf32>
    %26 = vector.broadcast %25 : vector<1x256xf32> to vector<8x256xf32>
    %27 = arith.addf %24, %26 : vector<8x256xf32>
    %c0_18 = arith.constant 0 : index
    %c0_19 = arith.constant 0 : index
    %28 = vector.load %arg9[%c0_18, %c0_19] : memref<1x256xf32, #tpu.memory_space<vmem>>, vector<1x256xf32>
    %29 = vector.broadcast %28 : vector<1x256xf32> to vector<8x256xf32>
    %30 = arith.mulf %0, %29 : vector<8x256xf32>
    %cst_20 = arith.constant dense<0.000000e+00> : vector<8xf32>
    %31 = vector.multi_reduction <add>, %30, %cst_20 [1] : vector<8x256xf32> to vector<8xf32>
    %32 = vector.shape_cast %31 : vector<8xf32> to vector<8x1xf32>
    %c0_21 = arith.constant 0 : index
    %c0_22 = arith.constant 0 : index
    %33 = vector.load %arg10[%c0_21, %c0_22] : memref<1x256xf32, #tpu.memory_space<vmem>>, vector<1x256xf32>
    %34 = vector.broadcast %33 : vector<1x256xf32> to vector<8x256xf32>
    %35 = arith.mulf %27, %34 : vector<8x256xf32>
    %cst_23 = arith.constant dense<0.000000e+00> : vector<8xf32>
    %36 = vector.multi_reduction <add>, %35, %cst_23 [1] : vector<8x256xf32> to vector<8xf32>
    %37 = vector.shape_cast %36 : vector<8xf32> to vector<8x1xf32>
    %38 = arith.addf %32, %37 : vector<8x1xf32>
    %c0_24 = arith.constant 0 : index
    %39 = memref.load %arg11[%c0_24] : memref<1xf32, #tpu.memory_space<smem>>
    %40 = vector.broadcast %39 : f32 to vector<8x1xf32>
    %41 = arith.addf %38, %40 : vector<8x1xf32>
    %42 = arith.negf %41 : vector<8x1xf32>
    %43 = math.exp %42 : vector<8x1xf32>
    %cst_25 = arith.constant 1.000000e+00 : f32
    %44 = vector.broadcast %cst_25 : f32 to vector<8x1xf32>
    %45 = arith.addf %44, %43 : vector<8x1xf32>
    %46 = arith.divf %44, %45 : vector<8x1xf32>
    %47 = vector.broadcast %46 : vector<8x1xf32> to vector<8x256xf32>
    %48 = arith.mulf %0, %47 : vector<8x256xf32>
    %cst_26 = arith.constant 1.000000e+00 : f32
    %49 = vector.broadcast %cst_26 : f32 to vector<8x1xf32>
    %50 = arith.subf %49, %46 : vector<8x1xf32>
    %51 = vector.broadcast %50 : vector<8x1xf32> to vector<8x256xf32>
    %52 = arith.mulf %27, %51 : vector<8x256xf32>
    %53 = arith.addf %48, %52 : vector<8x256xf32>
    %c0_27 = arith.constant 0 : index
    %c0_28 = arith.constant 0 : index
    %54 = vector.load %arg12[%c0_27, %c0_28] : memref<8x256xf32, #tpu.memory_space<vmem>>, vector<8x256xf32>
    tpu.vector_store %arg12[%c0_27, %c0_28], %53 {strides = array<i32>} : memref<8x256xf32, #tpu.memory_space<vmem>>, vector<8x256xf32>,
    return
  }
  func.func @transform_0(%arg0: i32) -> (i32, i32) {
    %c0_i32 = arith.constant 0 : i32
    %c0_i32_0 = arith.constant 0 : i32
    return %arg0, %c0_i32 : i32, i32
  }
  func.func @transform_1(%arg0: i32) -> (i32, i32) {
    %c0_i32 = arith.constant 0 : i32
    %c0_i32_0 = arith.constant 0 : i32
    return %arg0, %c0_i32 : i32, i32
  }
  func.func @transform_2(%arg0: i32) -> (i32, i32) {
    %c0_i32 = arith.constant 0 : i32
    %c0_i32_0 = arith.constant 0 : i32
    %c0_i32_1 = arith.constant 0 : i32
    return %c0_i32, %c0_i32_0 : i32, i32
  }
  func.func @transform_3(%arg0: i32) -> (i32, i32) {
    %c0_i32 = arith.constant 0 : i32
    %c0_i32_0 = arith.constant 0 : i32
    %c0_i32_1 = arith.constant 0 : i32
    return %c0_i32, %c0_i32_0 : i32, i32
  }
  func.func @transform_4(%arg0: i32) -> (i32, i32) {
    %c0_i32 = arith.constant 0 : i32
    %c0_i32_0 = arith.constant 0 : i32
    %c0_i32_1 = arith.constant 0 : i32
    return %c0_i32, %c0_i32_0 : i32, i32
  }
  func.func @transform_5(%arg0: i32) -> (i32, i32) {
    %c0_i32 = arith.constant 0 : i32
    %c0_i32_0 = arith.constant 0 : i32
    %c0_i32_1 = arith.constant 0 : i32
    return %c0_i32, %c0_i32_0 : i32, i32
  }
  func.func @transform_6(%arg0: i32) -> (i32, i32) {
    %c0_i32 = arith.constant 0 : i32
    %c0_i32_0 = arith.constant 0 : i32
    %c0_i32_1 = arith.constant 0 : i32
    return %c0_i32, %c0_i32_0 : i32, i32
  }
  func.func @transform_7(%arg0: i32) -> (i32, i32) {
    %c0_i32 = arith.constant 0 : i32
    %c0_i32_0 = arith.constant 0 : i32
    %c0_i32_1 = arith.constant 0 : i32
    return %c0_i32, %c0_i32_0 : i32, i32
  }
  func.func @transform_8(%arg0: i32) -> (i32, i32) {
    %c0_i32 = arith.constant 0 : i32
    %c0_i32_0 = arith.constant 0 : i32
    %c0_i32_1 = arith.constant 0 : i32
    return %c0_i32, %c0_i32_0 : i32, i32
  }
  func.func @transform_9(%arg0: i32) -> (i32, i32) {
    %c0_i32 = arith.constant 0 : i32
    %c0_i32_0 = arith.constant 0 : i32
    %c0_i32_1 = arith.constant 0 : i32
    return %c0_i32, %c0_i32_0 : i32, i32
  }
  func.func @transform_10(%arg0: i32) -> i32 {
    %c0_i32 = arith.constant 0 : i32
    %c0_i32_0 = arith.constant 0 : i32
    return %c0_i32 : i32
  }
  func.func @transform_11(%arg0: i32) -> (i32, i32) {
    %c0_i32 = arith.constant 0 : i32
    %c0_i32_0 = arith.constant 0 : i32
    return %arg0, %c0_i32 : i32, i32
  }
}

</mosaic_0001>

<bundles_post_ra>
// kernel: tpu_custom_call.1
= control target key start
LH: loop header
LB: loop body
LE: loop exit
PB: predicated region body
PF: predicated region fallthrough
CT: control target
= control target key end

     0   :  { %s1423_s0 = inlined_call_operand.hbm [shape: f32[16,256], index: 0, kind: input, shape index: {}]   ;;  %s1424_s1 = inlined_call_operand.vmem [shape: f32[16,2], index: 1, kind: input, shape index: {}]   ;;  %s1425_s2 = inlined_call_operand.vmem [shape: f32[2,64], index: 2, kind: input, shape index: {}]   ;;  %s1426_s3 = inlined_call_operand.vmem [shape: f32[1,64], index: 3, kind: input, shape index: {}]   ;;  %s1427_s4 = inlined_call_operand.hbm [shape: f32[64,128], index: 4, kind: input, shape index: {}]   ;;  %s1428_s5 = inlined_call_operand.vmem [shape: f32[1,128], index: 5, kind: input, shape index: {}]   ;;  %s1429_s6 = inlined_call_operand.hbm [shape: f32[128,256], index: 6, kind: input, shape index: {}]   ;;  %s1430_s7 = inlined_call_operand.vmem [shape: f32[1,256], index: 7, kind: input, shape index: {}]   ;;  %s1431_s8 = inlined_call_operand.vmem [shape: f32[1,256], index: 8, kind: input, shape index: {}]   ;;  %s1432_s9 = inlined_call_operand.vmem [shape: f32[1,256], index: 9, kind: input, shape index: {}]   ;;  %s1433_s10 = inlined_call_operand.<no memory space> [shape: f32[1], index: 10, kind: input, shape index: {}]   ;;  %s1434_s11 = inlined_call_operand.hbm [shape: f32[16,256], index: 11, kind: output, shape index: {}]  }
   0x1   :  { %1442 = sst [smem:[#allocation16_spill]] %s1427_s4 }
   0x2   :  { %1443 = sst [smem:[#allocation17_spill]] %s1429_s6 }
   0x3   :  { %16 = sst [smem:[#allocation2]] %s1433_s10 }
   0x4   :  { %17 = vsyncpa [#allocation4], 0 }
   0x5   :  { %19 = vsyncpa [#allocation4 + $0x1], 0 }
   0x6   :  { %20 = vsyncpa [#allocation7], 0 }
   0x7   :  { %21 = vsyncpa [#allocation5], 0 }
   0x8   :  { %23 = vsyncpa [#allocation5 + $0x1], 0  ;;  %s1218_s19 = smov 0   ;;  %s1220_s20 = smov 0  }
   0x9   :  { %s1222_s21 = smov 0   ;;  %s1224_s22 = smov 0  }
   0xa LB: > { %1444 = sst [smem:[#allocation13_spill]] %s1137_s21  ;;  %s1239_s10 = sadd.s32 4294967295, %s1141_s22   ;;  %s1141_s22 = sphi %s1224_s22, %s1463_s22   ;;  %s1137_s21 = sphi %s1222_s21, %s1465_s21   ;;  %s1133_s20 = sphi %s1220_s20, %s1467_s20   ;;  %s1129_s19 = sphi %s1218_s19, %s1466_s19  }
   0xb   : > { %s857_s23 = sadd.s32 4294967294, %s1141_s22   ;;  %p49_p0 = scmp.ne.s32.totalorder %s1133_s20, %s1129_s19 }
   0xc   : > { %p1435_p1 = scmp.eq.s32.totalorder %s1239_s10, 0  ;;  %p294_p3 = scmp.eq.s32.totalorder %s857_s23, 1 }
   0xd   : > { %p858_p5 = scmp.ge.s32.totalorder %s1141_s22, 1  ;;  %p301_p7 = scmp.lt.s32.totalorder %s1141_s22, 3 }
   0xe   : > { %p1248_p4 = por %p1435_p1, %p49_p0  ;;  %p1253_p6 = por %p294_p3, %p49_p0 }
   0xf   : > { %p1258_p8 = pnand %p858_p5, %p301_p7  ;;  %s1143_s27 = smov [#allocation6]  }
  0x10   : > { %s1445_s24 = scalar_select %p1248_p4, 1, 0 }
  0x11   : > { %s1446_s25 = scalar_select %p1253_p6, 1, 0 }
  0x12   : > { %s1447_s26 = scalar_select %p1258_p8, 1, 0 }
  0x13   : > { %s319_s28 = sshll.u32 %s1143_s27, 4  ;;  %p924_p9 = pneg %p1258_p8  ;;  %s320_s28 = int_to_ptr.vmem [resolvable:$true] %s319_s28 }
  0x14   : > { %s1144_s30 = smov [#allocation8]   ;;  %s1004_s13 = scalar_lea.vmem %s320_s28, 1024 }
  0x15   : > { %p1267_p11 = pnand %p924_p9, %p1435_p1  ;;  %s335_s12 = sshll.u32 %s1144_s30, 4  ;;  %s336_s12 = int_to_ptr.vmem [resolvable:$true] %s335_s12 }
  0x16   : > { %p1005_p13 = scmp.ne.s32.totalorder %s320_s28, %s1004_s13  ;;  %p1012_p5 = scmp.lt.s32.totalorder %s320_s28, %s320_s28 }
  0x17   : > { %p995_p12 = pneg %p1267_p11  ;;  %p1013_p7 = scmp.lt.s32.totalorder %s1004_s13, %s1004_s13 }
  0x19   : > { %p1007_p0 = pnand %p1005_p13, %p995_p12  ;;  %p1014_p10 = por %p1013_p7, %p1012_p5 }
  0x1b   : > { %p1008_p3 = pneg %p1007_p0 }
  0x1d   : > { %p1015_p9 = pnand %p1014_p10, %p1008_p3 }
  0x1f   : > { %1018 = shalt.err (!%p1015_p9)
}
  0x20   : > { %s1145_s14 = smov 128   ;;  %s1146_s15 = smov 8  }
  0x21   : > { %s1449_s4 = sld [smem:[#allocation16_spill]]  ;;  %s1030_s18 = scalar_lea.vmem %s336_s12, 4096 }
  0x22   : > { %p1031_p1 = scmp.ne.s32.totalorder %s336_s12, %s1030_s18  ;;  %p1038_p2 = scmp.lt.s32.totalorder %s336_s12, %s336_s12 }
  0x23   : > { %p1039_p6 = scmp.lt.s32.totalorder %s1030_s18, %s1030_s18 }
  0x24   : > { %p1033_p13 = pnand %p1031_p1, %p995_p12 }
  0x25   : > { %p1040_p5 = por %p1039_p6, %p1038_p2 }
  0x26   : > { %p1034_p0 = pneg %p1033_p13 }
  0x27   : > { %927 = dma.hbm_to_vmem [thread:$0]  (!%p1267_p11), %s1449_s4, 1024, %s320_s28, [#allocation7], %s1145_s14, %s1145_s14, %s1146_s15  }
  0x28   : > { %p1041_p10 = pnand %p1040_p5, %p1034_p0 }
  0x2a   : > { %1044 = shalt.err (!%p1041_p10)
}
  0x2b   : > { %s1147_s23 = smov 256   ;;  %s1148_s27 = smov 16  }
  0x2c   : > { %s1450_s6 = sld [smem:[#allocation17_spill]]  ;;  %s1290_s13 = sadd.s32 1, %s1141_s22  }
  0x2d   : > { %1451 = sst [smem:[#allocation14_spill]] %s1290_s13  ;;  %s33_s14 = ssub.s32 %s1141_s22, %s1290_s13 }
  0x2e   : > { %p34_p1 = scmp.eq.s32.totalorder %s33_s14, 0  ;;  %s36_s15 = sadd.s32 1, %s1137_s21 }
  0x2f   : > { %p43_p2 = scmp.ne.s32.totalorder %s1137_s21, %s1133_s20  ;;  %p44_p6 = scmp.eq.s32.totalorder %s1141_s22, 0 }
  0x30   : > { %s1299_s16 = scalar_select %p34_p1, %s1137_s21, %s36_s15  }
  0x31   : > { %p45_p12 = por %p44_p6, %p43_p2  ;;  %p1453_p3 = scmp.eq.s32.totalorder %s1239_s10, 1 }
  0x32   : > { %930 = dma.hbm_to_vmem [thread:$0]  (!%p1267_p11), %s1450_s6, 4096, %s336_s12, [#allocation7], %s1147_s23, %s1147_s23, %s1148_s27  }
  0x33   : > { %1452 = sst [smem:[#allocation15_spill]] %s1299_s16  ;;  %p1303_p7 = por %p1453_p3, %p43_p2 }
  0x34   : > { %p941_p9 = scmp.lt.s32.totalorder %s1141_s22, 2  ;;  %s361_s29 = sand.u32 1, %s1137_s21  }
  0x35   : > { %s1454_s17 = scalar_select %p1303_p7, 1, 0 }
  0x36   : > { %s862_s18 = sshll.u32 %s361_s29, 4  ;;  %s882_s12 = sshll.u32 %s1141_s22, 8 }
  0x37   : > { %s1313_s28 = scalar_lea.hbm %s1423_s0, %s882_s12  ;;  %s365_s30 = scalar_lea.vmem [#allocation3], %s862_s18 }
  0x38   : > { %s373_s14 = sshll.u32 %s365_s30, 4  ;;  %p1315_p11 = pnand %p941_p9, %p45_p12  ;;  %s374_s14 = int_to_ptr.vmem [resolvable:$true] %s373_s14 }
  0x39   : > { %s362_s4 = scalar_lea.sflag [#allocation4], %s361_s29  ;;  %s1045_s6 = scalar_lea.hbm %s1313_s28, 256 }
  0x3a   : > { %p1046_p13 = scmp.ne.s32.totalorder %s1313_s28, %s1045_s6  ;;  %p1047_p0 = pneg %p1315_p11 }
  0x3b   : > { %s1050_s27 = scalar_lea.hbm %s1423_s0, 512  ;;  %p1051_p1 = scmp.lt.s32.totalorder %s1313_s28, %s1423_s0 }
  0x3c   : > { %p1048_p5 = pnand %p1047_p0, %p1046_p13  ;;  %p1052_p2 = scmp.lt.s32.totalorder %s1050_s27, %s1045_s6 }
  0x3e   : > { %p1049_p10 = pneg %p1048_p5  ;;  %p1053_p6 = por %p1052_p2, %p1051_p1 }
  0x40   : > { %p1054_p12 = pnand %p1053_p6, %p1049_p10 }
  0x42   : > { %1057 = shalt.err (!%p1054_p12)
}
  0x43   : > { %s1058_s30 = scalar_lea.vmem %s374_s14, 256  ;;  %s1149_s29 = smov [#allocation3]  }
  0x44   : > { %p1059_p3 = scmp.ne.s32.totalorder %s374_s14, %s1058_s30  ;;  %s1063_s21 = sshll.u32 %s1149_s29, 4  ;;  %s1064_s21 = int_to_ptr.vmem [resolvable:$false] %s1063_s21 }
  0x45   : > { %s1065_s13 = scalar_lea.vmem %s1064_s21, 512  ;;  %p1066_p13 = scmp.lt.s32.totalorder %s374_s14, %s1064_s21 }
  0x46   : > { %p1061_p9 = pnand %p1059_p3, %p1047_p0  ;;  %p1067_p5 = scmp.lt.s32.totalorder %s1065_s13, %s1058_s30 }
  0x48   : > { %p1062_p7 = pneg %p1061_p9  ;;  %p1068_p4 = por %p1067_p5, %p1066_p13 }
  0x4a   : > { %p1069_p8 = pnand %p1068_p4, %p1062_p7 }
  0x4c   : > { %1072 = shalt.err (!%p1069_p8)
}
  0x4d   : > { %934 = dma.hbm_to_vmem [thread:$0]  (!%p1315_p11), %s1313_s28, 256, %s374_s14, %s362_s4  }
  0x4e   : > { %p1456_p10 = scmp.ne.s32.totalorder %s1447_s26, 0 }
  0x4f   : > { %s1336_s6 = sand.u32 (!%p1456_p10), 1, %s1133_s20   ;;  %p1457_p4 = scmp.ne.s32.totalorder (!%p1456_p10), %s1445_s24, 0 }
  0x50   : > { %389 = sbr.rel (%p1456_p10) target bundleno = 822 (0x336), region = 64  ;;  %s866_s16 = sshll.u32 (!%p1456_p10), %s1336_s6, 4 }
  0x51   : > { %s392_s21 = scalar_lea.sflag (!%p1456_p10), [#allocation4], %s1336_s6  ;;  %s1342_s13 = scalar_lea.vmem (!%p1456_p10), [#allocation3], %s866_s16 }
  0x55   : > { %1116 = dma.done.wait (%p1457_p4), %s392_s21, 256  }
  0x56   : > { %1118 = vsyncadd (%p1457_p4), %s392_s21, 4294967040  ;;  %p1458_p8 = scmp.eq.s32.totalorder %s1239_s10, 0 }
  0x58   : > { %1120 = dma.done.wait (%p1458_p8), [#allocation7], 5120   ;;  %p1459_p7 = pmov %p1458_p8 }
  0x59   : > { %p446_p11 = scmp.lt.s32.totalorder %s1239_s10, 1  ;;  %v1150_v0 = vmov 0   ;;  %v1151_v1 = vmov 0.0   ;;  %v491_v3 = vld [vmem:[#allocation6 + $0x38] sm:$0xff]  ;;  %v490_v4 = vld [vmem:[#allocation6 + $0x30] sm:$0xff]  ;;  %v489_v5 = vld [vmem:[#allocation6 + $0x28] sm:$0xff]  ;;  %v607_v58 = vlaneseq }
  0x5a   : > { %1122 = vsyncadd (%p1459_p7), [#allocation7], 4294962176  ;;  %987 = vset.pattern.permute.xlu0 %v1150_v0  ;;  %893 = vmatprep.subr.mxu0 %v1151_v1  ;;  %v488_v6 = vld [vmem:[#allocation6 + $0x20] sm:$0xff]  ;;  %v1152_v7 = vmov 1   ;;  %v487_v8 = vld [vmem:[#allocation6 + $0x18] sm:$0xff]  ;;  %vm1153_vm0 = vmmov 0  }
  0x5b   : > { %s447_s4 = scalar_select %p446_p11, %s1239_s10, 1  ;;  %681 = vmatprep.mubr.f32.mxu1 %v1151_v1  ;;  %894 = vmatpush3.msra.mxu0 %v491_v3  ;;  %v486_v9 = vld [vmem:[#allocation6 + $0x10] sm:$0xff]  ;;  %v485_v10 = vld [vmem:[#allocation6 + $0x8] sm:$0xff]  ;;  %v604_v11 = vld [vmem:[#allocation8 + $0xf8] sm:$0xff]  ;;  %vm499_vm1 = vcmask 523264   ;;  %v608_v59 = vshrl.u32 %v607_v58, 7 }
  0x5c   : > { %895 = vmatprep.subr.mxu0 %v1151_v1  ;;  %909 = vmatprep.mubr.msk.f32.mxu0 %vm1153_vm0, %v1151_v1  ;;  %v603_v12 = vld [vmem:[#allocation8 + $0xf0] sm:$0xff]  ;;  %v602_v13 = vld [vmem:[#allocation8 + $0xe8] sm:$0xff]  ;;  %v601_v14 = vld [vmem:[#allocation8 + $0xe0] sm:$0xff]  ;;  %s883_s12 = sshll.u32 %s1239_s10, 8  ;;  %s445_s23 = scalar_lea.vmem [#allocation9], %s866_s16 }
  0x5d   : > { %s870_s26 = sshll.u32 %s447_s4, 3  ;;  %896 = vmatpush3.msra.mxu0 %v490_v4  ;;  %617 = vmatprep.subr.mxu1 %v604_v11  ;;  %v484_v15 = vld [vmem:[#allocation6] sm:$0xff]  ;;  %v600_v16 = vld [vmem:[#allocation8 + $0xd8] sm:$0xff]  ;;  %v599_v17 = vld [vmem:[#allocation8 + $0xd0] sm:$0xff]  ;;  %v609_v60 = vsub.s32 0, %v608_v59  ;;  %v613_v61 = vsub.s32 1, %v608_v59  ;;  %s1386_s29 = scalar_lea.hbm %s1434_s11, %s883_s12 }
  0x5e   : > { %s449_s24 = scalar_lea.vmem %s1424_s1, %s870_s26  ;;  %897 = vmatprep.subr.mxu0 %v1151_v1  ;;  %618 = vmatpush1.msra.mxu1 %v603_v12  ;;  %v598_v18 = vld [vmem:[#allocation8 + $0xc8] sm:$0xff]  ;;  %v597_v19 = vld [vmem:[#allocation8 + $0xc0] sm:$0xff]  ;;  %v596_v20 = vld [vmem:[#allocation8 + $0xb8] sm:$0xff]  ;;  %s756_s27 = sshll.u32 %s445_s23, 4  ;;  %s757_s27 = int_to_ptr.vmem [resolvable:$true] %s756_s27 }
  0x5f   : > { %v452_v2 = vld [vmem:[%s449_s24] sm:$0xff]  ;;  %898 = vmatpush3.msra.mxu0 %v489_v5  ;;  %619 = vmatprep.subr.mxu1 %v602_v13  ;;  %v595_v21 = vld [vmem:[#allocation8 + $0xb0] sm:$0xff]  ;;  %v594_v22 = vld [vmem:[#allocation8 + $0xa8] sm:$0xff]  ;;  %s742_s21 = scalar_lea.sflag [#allocation5], %s1336_s6  ;;  %s1073_s10 = scalar_lea.vmem %s757_s27, 256 }
  0x60   : > { %456 = vperm.xlu0 %987, %v452_v2   ;;  %899 = vmatprep.subr.mxu0 %v1151_v1  ;;  %v593_v23 = vld [vmem:[#allocation8 + $0xa0] sm:$0xff]  ;;  %v592_v24 = vld [vmem:[#allocation8 + $0x98] sm:$0xff]  ;;  %v591_v25 = vld [vmem:[#allocation8 + $0x90] sm:$0xff]  ;;  %p1074_p0 = scmp.ne.s32.totalorder %s757_s27, %s1073_s10  ;;  %p1460_p1 = scmp.ne.s32.totalorder %s1454_s17, 0 }
  0x61   : > { %900 = vmatpush3.msra.mxu0 %v488_v6  ;;  %620 = vmatpush1.msra.mxu1 %v601_v14  ;;  %v590_v26 = vld [vmem:[#allocation8 + $0x88] sm:$0xff]  ;;  %v589_v27 = vld [vmem:[#allocation8 + $0x80] sm:$0xff]  ;;  %v588_v28 = vld [vmem:[#allocation8 + $0x78] sm:$0xff]  ;;  %s1154_s16 = smov [#allocation9]  }
  0x62   : > { %901 = vmatprep.subr.mxu0 %v1151_v1  ;;  %621 = vmatprep.subr.mxu1 %v600_v16  ;;  %v587_v29 = vld [vmem:[#allocation8 + $0x70] sm:$0xff]  ;;  %v586_v30 = vld [vmem:[#allocation8 + $0x68] sm:$0xff]  ;;  %v585_v31 = vld [vmem:[#allocation8 + $0x60] sm:$0xff]  ;;  %p1075_p2 = pnand %p1074_p0, %p1460_p1  ;;  %s1077_s4 = sshll.u32 %s1154_s16, 4  ;;  %s1078_s4 = int_to_ptr.vmem [resolvable:$false] %s1077_s4 }
  0x63   : > { %902 = vmatpush3.msra.mxu0 %v487_v8  ;;  %622 = vmatpush1.msra.mxu1 %v599_v17  ;;  %v584_v32 = vld [vmem:[#allocation8 + $0x58] sm:$0xff]  ;;  %v583_v33 = vld [vmem:[#allocation8 + $0x50] sm:$0xff]  ;;  %v582_v34 = vld [vmem:[#allocation8 + $0x48] sm:$0xff]  ;;  %s1079_s26 = scalar_lea.vmem %s1078_s4, 512  ;;  %p1080_p12 = scmp.lt.s32.totalorder %s757_s27, %s1078_s4 }
  0x64   : > { %988 = vset.pattern.permute.xlu0 %v1152_v7  ;;  %903 = vmatprep.subr.mxu0 %v1151_v1  ;;  %v581_v35 = vld [vmem:[#allocation8 + $0x40] sm:$0xff]  ;;  %v580_v36 = vld [vmem:[#allocation8 + $0x38] sm:$0xff]  ;;  %v579_v37 = vld [vmem:[#allocation8 + $0x30] sm:$0xff]  ;;  %p1076_p6 = pneg %p1075_p2  ;;  %p1081_p3 = scmp.lt.s32.totalorder %s1079_s26, %s1073_s10 }
  0x65   : > { %466 = vperm.xlu0 %988, %v452_v2   ;;  %904 = vmatpush3.msra.mxu0 %v486_v9  ;;  %v578_v38 = vld [vmem:[#allocation8 + $0x28] sm:$0xff]  ;;  %v577_v39 = vld [vmem:[#allocation8 + $0x20] sm:$0xff]  ;;  %v576_v40 = vld [vmem:[#allocation8 + $0x18] sm:$0xff] }
  0x66   : > { %905 = vmatprep.subr.mxu0 %v1151_v1  ;;  %623 = vmatprep.subr.mxu1 %v598_v18  ;;  %v871_v42 = vld [vmem:[%s1425_s2] ss:$0 sm:$0xff]  ;;  %v872_v43 = vld [vmem:[%s1425_s2 + $0x1] ss:$0 sm:$0xff]  ;;  %v575_v51 = vld [vmem:[#allocation8 + $0x10] sm:$0xff]  ;;  %p1082_p9 = por %p1081_p3, %p1080_p12 }
  0x67   : > { %906 = vmatpush3.msra.mxu0 %v485_v10  ;;  %624 = vmatpush1.msra.mxu1 %v597_v19  ;;  %v873_v47 = vld [vmem:[%s1426_s3] ss:$0 sm:$0xff]  ;;  %v574_v52 = vld [vmem:[#allocation8 + $0x8] sm:$0xff] }
  0x68   : > { %907 = vmatprep.subr.mxu0 %v1151_v1  ;;  %625 = vmatprep.subr.mxu1 %v596_v20  ;;  %v573_v53 = vld [vmem:[#allocation8] sm:$0xff]  ;;  %v451_v2 = vld [vmem:[%s1342_s13 + $0x8] sm:$0xff]  ;;  %p1083_p13 = pnand %p1082_p9, %p1076_p6 }
  0x69   : > { %908 = vmatpush3.msra.mxu0 %v484_v15  ;;  %626 = vmatpush1.msra.mxu1 %v595_v21  ;;  %v874_v54 = vld [vmem:[%s1428_s5] ss:$0 sm:$0xff] }
  0x6a   : > { %627 = vmatprep.subr.mxu1 %v594_v22  ;;  %v688_v62 = vld [vmem:[%s1431_s8] sm:$0x3] }
  0x6b   : > { %628 = vmatpush1.msra.mxu1 %v593_v23  ;;  %v693_v63 = vrot.slane %v688_v62, %v609_v60  ;;  %v697_v0 = vrot.slane %v688_v62, %v613_v61  ;;  %v450_v1 = vld [vmem:[%s1342_s13] sm:$0xff]  ;;  %s723_s13 = sld [smem:[#allocation2]] }
  0x6c   : > { %629 = vmatprep.subr.mxu1 %v592_v24  ;;  %v605_v6 = vld [vmem:[%s1430_s7] sm:$0x3] }
  0x6d   : > { %630 = vmatpush1.msra.mxu1 %v591_v25  ;;  %v700_v3 = vmul.f32 %v693_v63, %v450_v1  ;;  %v701_v4 = vmul.f32 %v697_v0, %v451_v2  ;;  %v610_v7 = vrot.slane %v605_v6, %v609_v60  ;;  %v705_v8 = vld [vmem:[%s1432_s9] sm:$0x3]  ;;  %v614_v9 = vrot.slane %v605_v6, %v613_v61 }
  0x6e   : > { %631 = vmatprep.subr.mxu1 %v590_v26  ;;  %v710_v12 = vrot.slane %v705_v8, %v609_v60  ;;  %v714_v13 = vrot.slane %v705_v8, %v613_v61 }
  0x6f   : > { %632 = vmatpush1.msra.mxu1 %v589_v27  ;;  %v702_v5 = vadd.f32 %v701_v4, %v700_v3 }
  0x70   : > { %633 = vmatprep.subr.mxu1 %v588_v28 }
  0x71   : > { %634 = vmatpush1.msra.mxu1 %v587_v29  ;;  %703 = vadd.xlane.f32.xlu1 %v702_v5  ;;  %v724_v20 = vstv %s723_s13 }
  0x72   : > { %635 = vmatprep.subr.mxu1 %v586_v30 }
  0x73   : > { %636 = vmatpush1.msra.mxu1 %v585_v31 }
  0x74   : > { %637 = vmatprep.subr.mxu1 %v584_v32 }
  0x75   : > { %638 = vmatpush1.msra.mxu1 %v583_v33 }
  0x76   : > { %639 = vmatprep.subr.mxu1 %v582_v34 }
  0x77   : > { %640 = vmatpush1.msra.mxu1 %v581_v35 }
  0x78   : > { %641 = vmatprep.subr.mxu1 %v580_v36 }
  0x79   : > { %642 = vmatpush1.msra.mxu1 %v579_v37 }
  0x7a   : > { %643 = vmatprep.subr.mxu1 %v578_v38 }
  0x7b   : > { %644 = vmatpush1.msra.mxu1 %v577_v39 }
  0x7c   : > { %645 = vmatprep.subr.mxu1 %v576_v40 }
  0x7d   : > { %646 = vmatpush1.msra.mxu1 %v575_v51 }
  0x7e   : > { %647 = vmatprep.subr.mxu1 %v574_v52 }
  0x7f   : > { %648 = vmatpush1.msra.mxu1 %v573_v53 }
  0xdb   : > { %v457_v41 = vpop.permute.xlu0 %456 }
  0xdc   : > { %v463_v45 = vmul.f32 %v871_v42, %v457_v41 }
  0xe0   : > { %v467_v44 = vpop.permute.xlu0 %466 }
  0xe1   : > { %v473_v46 = vmul.f32 %v872_v43, %v467_v44 }
  0xe3   : > { %v474_v48 = vadd.f32 %v473_v46, %v463_v45 }
  0xe5   : > { %v482_v49 = vadd.f32 %v873_v47, %v474_v48 }
  0xe7   : > { %v483_v50 = vmax.f32 %v482_v49, 0.0 }
  0xe9   : > { %910 = vmatmul.mubr.msk.f32.vlgmr.msra.gmra.mxu0 %vm499_vm1, %v483_v50 }
  0xfa   : > { %v704_v19 = vpop.xlane.xlu1 %703 }
 0x1a9   : > { %v569_v55 = vpop.f32.mrf.mxu0 }
 0x1aa   : > { %v570_v56 = vadd.f32 %v874_v54, %v569_v55 }
 0x1ab   : > { %v911_v57 = vpop.f32.mrf.mxu0 }
 0x1ac   : > { %682 = vmatmul.mubr.f32.vlgmr.msra.gmra.mxu1 %v570_v56 }
 0x26c   : > { %v683_v10 = vpop.f32.mrf.mxu1 }
 0x26d   : > { %v684_v11 = vadd.f32 %v683_v10, %v610_v7 }
 0x26e   : > { %v685_v14 = vpop.f32.mrf.mxu1 }
 0x26f   : > { %v686_v15 = vadd.f32 %v685_v14, %v614_v9  ;;  %v717_v16 = vmul.f32 %v710_v12, %v684_v11 }
 0x271   : > { %v718_v17 = vmul.f32 %v714_v13, %v686_v15 }
 0x273   : > { %v719_v18 = vadd.f32 %v718_v17, %v717_v16 }
 0x275   : > { %720 = vadd.xlane.f32.xlu1 %v719_v18 }
 0x2fe   : > { %v721_v21 = vpop.xlane.xlu1 %720 }
 0x2ff   : > { %v722_v22 = vadd.f32 %v721_v21, %v704_v19 }
 0x301   : > { %v725_v23 = vadd.f32 %v724_v20, %v722_v22 }
 0x303   : > { %v876_v24 = vmul.f32 -1.442695, %v725_v23 }
 0x305   : > { %989 = vpow2.f32 %v876_v24 }
 0x312   : > { %v990_v25 = vpop.eup %989 }
 0x313   : > { %v729_v26 = vadd.f32 1.0, %v990_v25 }
 0x315   : > { %991 = vrcp.f32 %v729_v26 }
 0x322   : > { %v992_v27 = vpop.eup %991 }
 0x323   : > { %v734_v28 = vsub.f32 1.0, %v992_v27  ;;  %v732_v29 = vmul.f32 %v992_v27, %v450_v1  ;;  %v733_v30 = vmul.f32 %v992_v27, %v451_v2 }
 0x325   : > { %v735_v31 = vmul.f32 %v734_v28, %v684_v11  ;;  %v736_v32 = vmul.f32 %v734_v28, %v686_v15 }
 0x327   : > { %v737_v33 = vadd.f32 %v735_v31, %v732_v29  ;;  %v738_v34 = vadd.f32 %v736_v32, %v733_v30 }
 0x329   : > { %739 = vst [vmem:[%s445_s23] sm:$0xff] %v737_v33  ;;  %740 = vst [vmem:[%s445_s23 + $0x8] sm:$0xff] %v738_v34 }
 0x32a   : > { %1086 = shalt.err (!%p1083_p13)
}
 0x32b   : > { %s1087_s28 = scalar_lea.hbm %s1386_s29, 256  ;;  %s1091_s24 = scalar_lea.hbm %s1434_s11, 512 }
 0x32c   : > { %p1088_p5 = scmp.ne.s32.totalorder %s1386_s29, %s1087_s28  ;;  %p1092_p8 = scmp.lt.s32.totalorder %s1386_s29, %s1434_s11 }
 0x32d   : > { %p1093_p7 = scmp.lt.s32.totalorder %s1091_s24, %s1087_s28 }
 0x32e   : > { %p1089_p10 = pnand %p1088_p5, %p1460_p1 }
 0x32f   : > { %p1094_p11 = por %p1093_p7, %p1092_p8 }
 0x330   : > { %p1090_p4 = pneg %p1089_p10 }
 0x332   : > { %p1095_p0 = pnand %p1094_p11, %p1090_p4 }
 0x334   : > { %1098 = shalt.err (!%p1095_p0)
}
 0x335   : > { %922 = dma.vmem_to_hbm [thread:$0]  (%p1460_p1), %s757_s27, 256, %s1386_s29, %s742_s21  }
 0x336 PF: > { %s768_s12 = sand.u32 1, %s1129_s19   ;;  %p1461_p2 = scmp.ne.s32.totalorder %s1446_s25, 0 }
 0x337   : > { %p1462_p6 = scmp.ge.s32.totalorder %s1141_s22, 2  ;;  %s769_s23 = scalar_lea.sflag [#allocation5], %s768_s12 }
 0x339   : > { %p936_p12 = pnand %p1462_p6, %p1461_p2 }
 0x33b   : > { %p937_p3 = pneg %p936_p12 }
 0x33d   : > { %1124 = dma.done.wait (%p937_p3), %s769_s23, 256  }
 0x33e   : > { %1126 = vsyncadd (%p937_p3), %s769_s23, 4294967040  ;;  %s1463_s22 = sld [smem:[#allocation14_spill]]  ;;  %s1466_s19 = smov %s1133_s20 }
 0x33f   : > { %s1464_s18 = sld [smem:[#allocation13_spill]] }
 0x340   : > { %s1465_s21 = sld [smem:[#allocation15_spill]] }
 0x344   : > { %p26_p9 = scmp.ge.s32.totalorder %s1463_s22, 4  }
 0x345   : > { %s1467_s20 = smov %s1464_s18 }
 0x346   :  { %28 = sbr.rel (!%p26_p9) target bundleno = 10 (0xa), region = 120 }
 0x34b   :  { %774 = vsyncpa [#allocation4], 1 }
 0x34c   :  { %776 = vsyncpa [#allocation4 + $0x1], 1 }
 0x34d   :  { %777 = vsyncpa [#allocation7], 1 }
 0x34e   :  { %778 = vsyncpa [#allocation5], 1 }
 0x34f   :  { %780 = vsyncpa [#allocation5 + $0x1], 1 }

</bundles_post_ra>
